<compile_context>
chip_gen: v5e
topology: v5e:2x2
jax: 0.10.0
libtpu: 0.0.40
codegen_flags: <defaults>
</compile_context>

<pallas_src>
import functools

import jax
import jax.numpy as jnp
from jax.experimental import pallas as pl
from jax.experimental.pallas import tpu as pltpu

_LANE = 128      # vreg lane width; feature dims padded to multiples of this
_SUBLANE = 8     # vreg sublane count; batch tiles padded to multiples of this
_MAX_BLOCK_B = 256  # MXU-aligned batch tile (multiple of 128 and 256)


def _round_up(n, m):
    return ((n + m - 1) // m) * m


def _mlp_kernel(x_ref,
                w1_ref, b1_ref,
                w2_ref, b2_ref,
                w3_ref, b3_ref,
                w4_ref, b4_ref,
                o_ref):
    """Fused 4-layer MLP on one [block_b, in_p] batch tile."""

    def dense(h, w_ref, b_ref):
        # Cast LHS to the weight dtype (f32 or bf16); accumulate in f32.
        return (jnp.dot(h.astype(w_ref.dtype), w_ref[...],
                        preferred_element_type=jnp.float32)
                + b_ref[...].astype(jnp.float32))

    h = x_ref[...].astype(jnp.float32)

    # input_layer + sigmoid
    h = jax.nn.sigmoid(dense(h, w1_ref, b1_ref))
    # hidden_layer_1 + sigmoid
    h = jax.nn.sigmoid(dense(h, w2_ref, b2_ref))
    # hidden_layer_2 + sigmoid
    h = jax.nn.sigmoid(dense(h, w3_ref, b3_ref))
    # output_layer (no activation)
    o_ref[...] = dense(h, w4_ref, b4_ref).astype(o_ref.dtype)


@functools.partial(jax.jit, static_argnames=("block_b", "matmul_dtype"))
def mlp_forward(x, params, block_b=None, matmul_dtype=None):
    """x: [B, input_size] float32. params: dict of transposed weights + biases.

    block_b:       optional static batch-tile override (rounded up to 8).
    matmul_dtype:  e.g. jnp.bfloat16 on v6e/v7x for ~2x MXU throughput
                   (accumulation stays f32). Default: keep weight dtype (f32).
    """
    B, in_features = x.shape
    w1, b1 = params["w1"], params["b1"]
    w2, b2 = params["w2"], params["b2"]
    w3, b3 = params["w3"], params["b3"]
    w4, b4 = params["w4"], params["b4"]
    out_features = w4.shape[1]

    # ---- lane-dense zero padding of every feature dimension -----------------
    def pad2(a, rows, cols):
        return jnp.pad(a, ((0, rows - a.shape[0]), (0, cols - a.shape[1])))

    in_p = _round_up(in_features, _LANE)
    h1_p = _round_up(w1.shape[1], _LANE)
    h2_p = _round_up(w2.shape[1], _LANE)
    h3_p = _round_up(w3.shape[1], _LANE)
    out_p = _round_up(out_features, _LANE)

    wdt = jnp.dtype(matmul_dtype) if matmul_dtype is not None else w1.dtype
    # Padded hidden units get pre-activation 0 -> sigmoid 0.5, but the
    # corresponding (zero-padded) rows of the next weight matrix kill their
    # contribution, so the math is exact.
    w1p = pad2(w1, in_p, h1_p).astype(wdt)
    w2p = pad2(w2, h1_p, h2_p).astype(wdt)
    w3p = pad2(w3, h2_p, h3_p).astype(wdt)
    w4p = pad2(w4, h3_p, out_p).astype(wdt)
    b1p = pad2(b1, 1, h1_p)
    b2p = pad2(b2, 1, h2_p)
    b3p = pad2(b3, 1, h3_p)
    b4p = pad2(b4, 1, out_p)

    # ---- MXU-aligned batch tiling -------------------------------------------
    if block_b is None:
        block_b = _round_up(B, _SUBLANE) if B <= _MAX_BLOCK_B else _MAX_BLOCK_B
    else:
        block_b = _round_up(int(block_b), _SUBLANE)
    Bp = _round_up(max(B, block_b), block_b)
    xp = pad2(x, Bp, in_p)

    grid = (Bp // block_b,)

    # Whole weight/bias arrays live in VMEM once (no per-step double-buffer).
    vmem_full = pl.BlockSpec(memory_space=pltpu.MemorySpace.VMEM)

    out_padded = pl.pallas_call(
        _mlp_kernel,
        out_shape=jax.ShapeDtypeStruct((Bp, out_p), x.dtype),
        grid_spec=pltpu.PrefetchScalarGridSpec(
            num_scalar_prefetch=0,
            grid=grid,
            in_specs=[
                pl.BlockSpec((block_b, in_p), lambda i: (i, 0)),  # x tile
                vmem_full, vmem_full,   # w1, b1
                vmem_full, vmem_full,   # w2, b2
                vmem_full, vmem_full,   # w3, b3
                vmem_full, vmem_full,   # w4, b4
            ],
            out_specs=pl.BlockSpec((block_b, out_p), lambda i: (i, 0)),
        ),
        compiler_params=pltpu.CompilerParams(
            dimension_semantics=("parallel",)),  # batch axis -> megacore on v7x
    )(xp, w1p, b1p, w2p, b2p, w3p, b3p, w4p, b4p)

    return out_padded[:B, :out_features]


def init_mlp_params(key, input_size, hidden_size_1, hidden_size_2, output_size,
                    dtype=jnp.float32):
    """Deterministic init mimicking nn.Linear's U(-1/sqrt(fan_in), 1/sqrt(fan_in)).

    Weights are stored already transposed to [in, out] for the kernel.
    """
    dims = [
        ("w1", "b1", input_size, hidden_size_1),
        ("w2", "b2", hidden_size_1, hidden_size_2),
        ("w3", "b3", hidden_size_2, hidden_size_2),
        ("w4", "b4", hidden_size_2, output_size),
    ]
    params = {}
    for wname, bname, fan_in, fan_out in dims:
        key, kw, kb = jax.random.split(key, 3)
        bound = 1.0 / jnp.sqrt(fan_in)
        params[wname] = jax.random.uniform(
            kw, (fan_in, fan_out), dtype, minval=-bound, maxval=bound)
        params[bname] = jax.random.uniform(
            kb, (1, fan_out), dtype, minval=-bound, maxval=bound)
    return params


def mlp_reference(x, params):
    """Pure-JAX reference of the PyTorch forward."""
    h = jax.nn.sigmoid(x @ params["w1"] + params["b1"])
    h = jax.nn.sigmoid(h @ params["w2"] + params["b2"])
    h = jax.nn.sigmoid(h @ params["w3"] + params["b3"])
    return h @ params["w4"] + params["b4"]


if __name__ == "__main__":
    # Small shapes consistent with the module: input=32, h1=64, h2=64, out=16.
    input_size, hidden_size_1, hidden_size_2, output_size = 32, 64, 64, 16
    batch = 8

    key = jax.random.PRNGKey(0)
    key, kx = jax.random.split(key)
    x = jax.random.normal(kx, (batch, input_size), dtype=jnp.float32)

    params = init_mlp_params(key, input_size, hidden_size_1, hidden_size_2,
                             output_size)

    # Small-batch path: single block, no grid overhead.
    out = jax.block_until_ready(mlp_forward(x, params))
    ref = mlp_reference(x, params)
    assert out.shape == (batch, output_size), out.shape
    assert jnp.allclose(out, ref, atol=1e-5, rtol=1e-5), (
        float(jnp.max(jnp.abs(out - ref))))

    # Tiled path: non-aligned larger batch exercises 256-row tiles, batch
    # padding, and a multi-step ("parallel") grid.
    x_big = jax.random.normal(jax.random.PRNGKey(1), (640, input_size),
                              dtype=jnp.float32)
    out_big = jax.block_until_ready(mlp_forward(x_big, params))
    ref_big = mlp_reference(x_big, params)
    assert out_big.shape == (640, output_size), out_big.shape
    assert jnp.allclose(out_big, ref_big, atol=1e-5, rtol=1e-5), (
        float(jnp.max(jnp.abs(out_big - ref_big))))

    print("KERNEL_OK")
</pallas_src>

<mosaic_0001>
module attributes {stable_mosaic.version = 11 : i64} {
  func.func @_mlp_kernel(%arg0: i32, %arg1: memref<8x128xf32, #tpu.memory_space<vmem>>, %arg2: memref<128x128xf32, #tpu.memory_space<vmem>>, %arg3: memref<1x128xf32, #tpu.memory_space<vmem>>, %arg4: memref<128x128xf32, #tpu.memory_space<vmem>>, %arg5: memref<1x128xf32, #tpu.memory_space<vmem>>, %arg6: memref<128x128xf32, #tpu.memory_space<vmem>>, %arg7: memref<1x128xf32, #tpu.memory_space<vmem>>, %arg8: memref<128x128xf32, #tpu.memory_space<vmem>>, %arg9: memref<1x128xf32, #tpu.memory_space<vmem>>, %arg10: memref<8x128xf32, #tpu.memory_space<vmem>>) attributes {dimension_semantics = [#tpu.dimension_semantics<parallel>], iteration_bounds = array<i64: 1>, scalar_prefetch = 0 : i64, scratch_operands = 0 : i64, tpu.core_type = #tpu.core_type<tc>, window_params = [{transform_indices = @transform_0, window_bounds = array<i64: 8, 128>}, {pipeline_mode = #tpu.pipeline_mode<synchronous>, transform_indices = @transform_1, window_bounds = array<i64: 128, 128>}, {pipeline_mode = #tpu.pipeline_mode<synchronous>, transform_indices = @transform_2, window_bounds = array<i64: 1, 128>}, {pipeline_mode = #tpu.pipeline_mode<synchronous>, transform_indices = @transform_3, window_bounds = array<i64: 128, 128>}, {pipeline_mode = #tpu.pipeline_mode<synchronous>, transform_indices = @transform_4, window_bounds = array<i64: 1, 128>}, {pipeline_mode = #tpu.pipeline_mode<synchronous>, transform_indices = @transform_5, window_bounds = array<i64: 128, 128>}, {pipeline_mode = #tpu.pipeline_mode<synchronous>, transform_indices = @transform_6, window_bounds = array<i64: 1, 128>}, {pipeline_mode = #tpu.pipeline_mode<synchronous>, transform_indices = @transform_7, window_bounds = array<i64: 128, 128>}, {pipeline_mode = #tpu.pipeline_mode<synchronous>, transform_indices = @transform_8, window_bounds = array<i64: 1, 128>}, {transform_indices = @transform_9, window_bounds = array<i64: 8, 128>}]} {
    %c0 = arith.constant 0 : index
    %c0_0 = arith.constant 0 : index
    %0 = vector.load %arg1[%c0, %c0_0] : memref<8x128xf32, #tpu.memory_space<vmem>>, vector<8x128xf32>
    %c0_1 = arith.constant 0 : index
    %c0_2 = arith.constant 0 : index
    %1 = vector.load %arg2[%c0_1, %c0_2] : memref<128x128xf32, #tpu.memory_space<vmem>>, vector<128x128xf32>
    %cst = arith.constant dense<0.000000e+00> : vector<8x128xf32>
    %2 = tpu.matmul %0, %1, %cst {dimension_numbers = #tpu.dot_dimension_numbers<[1], [0], [0], [1], [0, 0, 1, 1], [], []>} : vector<8x128xf32>, vector<128x128xf32>, vector<8x128xf32> -> vector<8x128xf32>
    %c0_3 = arith.constant 0 : index
    %c0_4 = arith.constant 0 : index
    %3 = vector.load %arg3[%c0_3, %c0_4] : memref<1x128xf32, #tpu.memory_space<vmem>>, vector<1x128xf32>
    %4 = vector.broadcast %3 : vector<1x128xf32> to vector<8x128xf32>
    %5 = arith.addf %2, %4 : vector<8x128xf32>
    %6 = arith.negf %5 : vector<8x128xf32>
    %7 = math.exp %6 : vector<8x128xf32>
    %cst_5 = arith.constant 1.000000e+00 : f32
    %8 = vector.broadcast %cst_5 : f32 to vector<8x128xf32>
    %9 = arith.addf %8, %7 : vector<8x128xf32>
    %10 = arith.divf %8, %9 : vector<8x128xf32>
    %c0_6 = arith.constant 0 : index
    %c0_7 = arith.constant 0 : index
    %11 = vector.load %arg4[%c0_6, %c0_7] : memref<128x128xf32, #tpu.memory_space<vmem>>, vector<128x128xf32>
    %cst_8 = arith.constant dense<0.000000e+00> : vector<8x128xf32>
    %12 = tpu.matmul %10, %11, %cst_8 {dimension_numbers = #tpu.dot_dimension_numbers<[1], [0], [0], [1], [0, 0, 1, 1], [], []>} : vector<8x128xf32>, vector<128x128xf32>, vector<8x128xf32> -> vector<8x128xf32>
    %c0_9 = arith.constant 0 : index
    %c0_10 = arith.constant 0 : index
    %13 = vector.load %arg5[%c0_9, %c0_10] : memref<1x128xf32, #tpu.memory_space<vmem>>, vector<1x128xf32>
    %14 = vector.broadcast %13 : vector<1x128xf32> to vector<8x128xf32>
    %15 = arith.addf %12, %14 : vector<8x128xf32>
    %16 = arith.negf %15 : vector<8x128xf32>
    %17 = math.exp %16 : vector<8x128xf32>
    %cst_11 = arith.constant 1.000000e+00 : f32
    %18 = vector.broadcast %cst_11 : f32 to vector<8x128xf32>
    %19 = arith.addf %18, %17 : vector<8x128xf32>
    %20 = arith.divf %18, %19 : vector<8x128xf32>
    %c0_12 = arith.constant 0 : index
    %c0_13 = arith.constant 0 : index
    %21 = vector.load %arg6[%c0_12, %c0_13] : memref<128x128xf32, #tpu.memory_space<vmem>>, vector<128x128xf32>
    %cst_14 = arith.constant dense<0.000000e+00> : vector<8x128xf32>
    %22 = tpu.matmul %20, %21, %cst_14 {dimension_numbers = #tpu.dot_dimension_numbers<[1], [0], [0], [1], [0, 0, 1, 1], [], []>} : vector<8x128xf32>, vector<128x128xf32>, vector<8x128xf32> -> vector<8x128xf32>
    %c0_15 = arith.constant 0 : index
    %c0_16 = arith.constant 0 : index
    %23 = vector.load %arg7[%c0_15, %c0_16] : memref<1x128xf32, #tpu.memory_space<vmem>>, vector<1x128xf32>
    %24 = vector.broadcast %23 : vector<1x128xf32> to vector<8x128xf32>
    %25 = arith.addf %22, %24 : vector<8x128xf32>
    %26 = arith.negf %25 : vector<8x128xf32>
    %27 = math.exp %26 : vector<8x128xf32>
    %cst_17 = arith.constant 1.000000e+00 : f32
    %28 = vector.broadcast %cst_17 : f32 to vector<8x128xf32>
    %29 = arith.addf %28, %27 : vector<8x128xf32>
    %30 = arith.divf %28, %29 : vector<8x128xf32>
    %c0_18 = arith.constant 0 : index
    %c0_19 = arith.constant 0 : index
    %31 = vector.load %arg8[%c0_18, %c0_19] : memref<128x128xf32, #tpu.memory_space<vmem>>, vector<128x128xf32>
    %cst_20 = arith.constant dense<0.000000e+00> : vector<8x128xf32>
    %32 = tpu.matmul %30, %31, %cst_20 {dimension_numbers = #tpu.dot_dimension_numbers<[1], [0], [0], [1], [0, 0, 1, 1], [], []>} : vector<8x128xf32>, vector<128x128xf32>, vector<8x128xf32> -> vector<8x128xf32>
    %c0_21 = arith.constant 0 : index
    %c0_22 = arith.constant 0 : index
    %33 = vector.load %arg9[%c0_21, %c0_22] : memref<1x128xf32, #tpu.memory_space<vmem>>, vector<1x128xf32>
    %34 = vector.broadcast %33 : vector<1x128xf32> to vector<8x128xf32>
    %35 = arith.addf %32, %34 : vector<8x128xf32>
    %c0_23 = arith.constant 0 : index
    %c0_24 = arith.constant 0 : index
    %36 = vector.load %arg10[%c0_23, %c0_24] : memref<8x128xf32, #tpu.memory_space<vmem>>, vector<8x128xf32>
    tpu.vector_store %arg10[%c0_23, %c0_24], %35 {strides = array<i32>} : memref<8x128xf32, #tpu.memory_space<vmem>>, vector<8x128xf32>,
    return
  }
  func.func @transform_0(%arg0: i32) -> (i32, i32) {
    %c0_i32 = arith.constant 0 : i32
    %c0_i32_0 = arith.constant 0 : i32
    return %arg0, %c0_i32 : i32, i32
  }
  func.func @transform_1(%arg0: i32) -> (i32, i32) {
    %c0_i32 = arith.constant 0 : i32
    %c0_i32_0 = arith.constant 0 : i32
    %c0_i32_1 = arith.constant 0 : i32
    return %c0_i32, %c0_i32_0 : i32, i32
  }
  func.func @transform_2(%arg0: i32) -> (i32, i32) {
    %c0_i32 = arith.constant 0 : i32
    %c0_i32_0 = arith.constant 0 : i32
    %c0_i32_1 = arith.constant 0 : i32
    return %c0_i32, %c0_i32_0 : i32, i32
  }
  func.func @transform_3(%arg0: i32) -> (i32, i32) {
    %c0_i32 = arith.constant 0 : i32
    %c0_i32_0 = arith.constant 0 : i32
    %c0_i32_1 = arith.constant 0 : i32
    return %c0_i32, %c0_i32_0 : i32, i32
  }
  func.func @transform_4(%arg0: i32) -> (i32, i32) {
    %c0_i32 = arith.constant 0 : i32
    %c0_i32_0 = arith.constant 0 : i32
    %c0_i32_1 = arith.constant 0 : i32
    return %c0_i32, %c0_i32_0 : i32, i32
  }
  func.func @transform_5(%arg0: i32) -> (i32, i32) {
    %c0_i32 = arith.constant 0 : i32
    %c0_i32_0 = arith.constant 0 : i32
    %c0_i32_1 = arith.constant 0 : i32
    return %c0_i32, %c0_i32_0 : i32, i32
  }
  func.func @transform_6(%arg0: i32) -> (i32, i32) {
    %c0_i32 = arith.constant 0 : i32
    %c0_i32_0 = arith.constant 0 : i32
    %c0_i32_1 = arith.constant 0 : i32
    return %c0_i32, %c0_i32_0 : i32, i32
  }
  func.func @transform_7(%arg0: i32) -> (i32, i32) {
    %c0_i32 = arith.constant 0 : i32
    %c0_i32_0 = arith.constant 0 : i32
    %c0_i32_1 = arith.constant 0 : i32
    return %c0_i32, %c0_i32_0 : i32, i32
  }
  func.func @transform_8(%arg0: i32) -> (i32, i32) {
    %c0_i32 = arith.constant 0 : i32
    %c0_i32_0 = arith.constant 0 : i32
    %c0_i32_1 = arith.constant 0 : i32
    return %c0_i32, %c0_i32_0 : i32, i32
  }
  func.func @transform_9(%arg0: i32) -> (i32, i32) {
    %c0_i32 = arith.constant 0 : i32
    %c0_i32_0 = arith.constant 0 : i32
    return %arg0, %c0_i32 : i32, i32
  }
}

</mosaic_0001>

<bundles_post_ra>
// kernel: mlp_forward.1
= control target key start
LH: loop header
LB: loop body
LE: loop exit
PB: predicated region body
PF: predicated region fallthrough
CT: control target
= control target key end

     0   :  { %s575_s0 = inlined_call_operand.vmem [shape: f32[8,128], index: 0, kind: input, shape index: {}]   ;;  %s576_s1 = inlined_call_operand.vmem [shape: f32[128,128], index: 1, kind: input, shape index: {}]   ;;  %s577_s2 = inlined_call_operand.vmem [shape: f32[1,128], index: 2, kind: input, shape index: {}]   ;;  %s578_s3 = inlined_call_operand.vmem [shape: f32[128,128], index: 3, kind: input, shape index: {}]   ;;  %s579_s4 = inlined_call_operand.vmem [shape: f32[1,128], index: 4, kind: input, shape index: {}]   ;;  %s580_s5 = inlined_call_operand.vmem [shape: f32[128,128], index: 5, kind: input, shape index: {}]   ;;  %s581_s6 = inlined_call_operand.vmem [shape: f32[1,128], index: 6, kind: input, shape index: {}]   ;;  %s582_s7 = inlined_call_operand.vmem [shape: f32[128,128], index: 7, kind: input, shape index: {}]   ;;  %s583_s8 = inlined_call_operand.vmem [shape: f32[1,128], index: 8, kind: input, shape index: {}]   ;;  %s584_s9 = inlined_call_operand.hbm [shape: f32[8,128], index: 9, kind: output, shape index: {}]  }
   0x1   :  { %v49_v0 = vld [vmem:[%s576_s1 + $0x78] sm:$0xff]  ;;  %v48_v1 = vld [vmem:[%s576_s1 + $0x70] sm:$0xff]  ;;  %v47_v2 = vld [vmem:[%s576_s1 + $0x68] sm:$0xff] }
   0x2   :  { %54 = vmatpush.msra.mxu0 %v49_v0  ;;  %v46_v3 = vld [vmem:[%s576_s1 + $0x60] sm:$0xff]  ;;  %v45_v4 = vld [vmem:[%s576_s1 + $0x58] sm:$0xff] }
   0x4   :  { %55 = vmatpush.msra.mxu0 %v48_v1 }
   0x6   :  { %56 = vmatpush.msra.mxu0 %v47_v2 }
   0x8   :  { %57 = vmatpush.msra.mxu0 %v46_v3 }
   0x9   :  { %14 = vsyncpa [#allocation3], 0  ;;  %v44_v5 = vld [vmem:[%s576_s1 + $0x50] sm:$0xff]  ;;  %v43_v6 = vld [vmem:[%s576_s1 + $0x48] sm:$0xff]  ;;  %s314_s22 = smov [#allocation2]   ;;  %s259_s26 = sshll.u32 %s584_s9, 4  ;;  %s260_s26 = int_to_ptr.hbm [resolvable:$true] %s259_s26 }
   0xa   :  { %58 = vmatpush.msra.mxu0 %v45_v4  ;;  %v42_v7 = vld [vmem:[%s576_s1 + $0x40] sm:$0xff]  ;;  %v41_v8 = vld [vmem:[%s576_s1 + $0x38] sm:$0xff]  ;;  %v40_v9 = vld [vmem:[%s576_s1 + $0x30] sm:$0xff]  ;;  %s257_s23 = sshll.u32 %s314_s22, 4  ;;  %s258_s23 = int_to_ptr.vmem [resolvable:$true] %s257_s23 }
   0xb   :  { %v39_v10 = vld [vmem:[%s576_s1 + $0x28] sm:$0xff]  ;;  %v38_v11 = vld [vmem:[%s576_s1 + $0x20] sm:$0xff]  ;;  %v37_v12 = vld [vmem:[%s576_s1 + $0x18] sm:$0xff] }
   0xc   :  { %59 = vmatpush.msra.mxu0 %v44_v5  ;;  %v36_v13 = vld [vmem:[%s576_s1 + $0x10] sm:$0xff]  ;;  %v35_v14 = vld [vmem:[%s576_s1 + $0x8] sm:$0xff]  ;;  %v34_v15 = vld [vmem:[%s576_s1] sm:$0xff] }
   0xd   :  { %v33_v16 = vld [vmem:[%s575_s0] sm:$0xff]  ;;  %v108_v17 = vld [vmem:[%s578_s3 + $0x78] sm:$0xff]  ;;  %v107_v18 = vld [vmem:[%s578_s3 + $0x70] sm:$0xff] }
   0xe   :  { %60 = vmatpush.msra.mxu0 %v43_v6  ;;  %113 = vmatpush.msra.mxu1 %v108_v17  ;;  %v106_v19 = vld [vmem:[%s578_s3 + $0x68] sm:$0xff]  ;;  %v105_v20 = vld [vmem:[%s578_s3 + $0x60] sm:$0xff]  ;;  %v104_v21 = vld [vmem:[%s578_s3 + $0x58] sm:$0xff] }
   0xf   :  { %v103_v22 = vld [vmem:[%s578_s3 + $0x50] sm:$0xff]  ;;  %v102_v23 = vld [vmem:[%s578_s3 + $0x48] sm:$0xff]  ;;  %v101_v24 = vld [vmem:[%s578_s3 + $0x40] sm:$0xff] }
  0x10   :  { %61 = vmatpush.msra.mxu0 %v42_v7  ;;  %114 = vmatpush.msra.mxu1 %v107_v18  ;;  %v100_v25 = vld [vmem:[%s578_s3 + $0x38] sm:$0xff]  ;;  %v99_v26 = vld [vmem:[%s578_s3 + $0x30] sm:$0xff]  ;;  %v98_v27 = vld [vmem:[%s578_s3 + $0x28] sm:$0xff] }
  0x11   :  { %v97_v28 = vld [vmem:[%s578_s3 + $0x20] sm:$0xff]  ;;  %v96_v29 = vld [vmem:[%s578_s3 + $0x18] sm:$0xff]  ;;  %v95_v30 = vld [vmem:[%s578_s3 + $0x10] sm:$0xff] }
  0x12   :  { %62 = vmatpush.msra.mxu0 %v41_v8  ;;  %115 = vmatpush.msra.mxu1 %v106_v19  ;;  %v94_v31 = vld [vmem:[%s578_s3 + $0x8] sm:$0xff]  ;;  %v93_v32 = vld [vmem:[%s578_s3] sm:$0xff]  ;;  %v167_v49 = vld [vmem:[%s580_s5 + $0x78] sm:$0xff] }
  0x13   :  { %v272_v33 = vld [vmem:[%s577_s2] ss:$0 sm:$0xff]  ;;  %172 = vmatpush.msra.mxu2 %v167_v49  ;;  %v166_v50 = vld [vmem:[%s580_s5 + $0x70] sm:$0xff]  ;;  %v165_v51 = vld [vmem:[%s580_s5 + $0x68] sm:$0xff] }
  0x14   :  { %63 = vmatpush.msra.mxu0 %v40_v9  ;;  %116 = vmatpush.msra.mxu1 %v105_v20  ;;  %v164_v52 = vld [vmem:[%s580_s5 + $0x60] sm:$0xff]  ;;  %v163_v53 = vld [vmem:[%s580_s5 + $0x58] sm:$0xff]  ;;  %v162_v54 = vld [vmem:[%s580_s5 + $0x50] sm:$0xff] }
  0x15   :  { %173 = vmatpush.msra.mxu2 %v166_v50  ;;  %v161_v55 = vld [vmem:[%s580_s5 + $0x48] sm:$0xff]  ;;  %v160_v56 = vld [vmem:[%s580_s5 + $0x40] sm:$0xff]  ;;  %v159_v57 = vld [vmem:[%s580_s5 + $0x38] sm:$0xff] }
  0x16   :  { %64 = vmatpush.msra.mxu0 %v39_v10  ;;  %117 = vmatpush.msra.mxu1 %v104_v21  ;;  %v158_v58 = vld [vmem:[%s580_s5 + $0x30] sm:$0xff]  ;;  %v157_v59 = vld [vmem:[%s580_s5 + $0x28] sm:$0xff]  ;;  %v156_v60 = vld [vmem:[%s580_s5 + $0x20] sm:$0xff] }
  0x17   :  { %174 = vmatpush.msra.mxu2 %v165_v51  ;;  %v155_v61 = vld [vmem:[%s580_s5 + $0x18] sm:$0xff]  ;;  %v154_v62 = vld [vmem:[%s580_s5 + $0x10] sm:$0xff]  ;;  %v153_v63 = vld [vmem:[%s580_s5 + $0x8] sm:$0xff] }
  0x18   :  { %65 = vmatpush.msra.mxu0 %v38_v11  ;;  %118 = vmatpush.msra.mxu1 %v103_v22  ;;  %v152_v0 = vld [vmem:[%s580_s5] sm:$0xff]  ;;  %v226_v17 = vld [vmem:[%s582_s7 + $0x78] sm:$0xff]  ;;  %v225_v18 = vld [vmem:[%s582_s7 + $0x70] sm:$0xff] }
  0x19   :  { %175 = vmatpush.msra.mxu2 %v164_v52  ;;  %v273_v1 = vld [vmem:[%s579_s4] ss:$0 sm:$0xff]  ;;  %231 = vmatpush.msra.mxu3 %v226_v17  ;;  %v224_v19 = vld [vmem:[%s582_s7 + $0x68] sm:$0xff]  ;;  %v222_v21 = vld [vmem:[%s582_s7 + $0x58] sm:$0xff] }
  0x1a   :  { %66 = vmatpush.msra.mxu0 %v37_v12  ;;  %119 = vmatpush.msra.mxu1 %v102_v23  ;;  %v223_v20 = vld [vmem:[%s582_s7 + $0x60] sm:$0xff]  ;;  %v221_v22 = vld [vmem:[%s582_s7 + $0x50] sm:$0xff]  ;;  %v220_v23 = vld [vmem:[%s582_s7 + $0x48] sm:$0xff] }
  0x1b   :  { %176 = vmatpush.msra.mxu2 %v163_v53  ;;  %232 = vmatpush.msra.mxu3 %v225_v18  ;;  %v275_v49 = vld [vmem:[%s583_s8] ss:$0 sm:$0xff] }
  0x1c   :  { %67 = vmatpush.msra.mxu0 %v36_v13  ;;  %120 = vmatpush.msra.mxu1 %v101_v24  ;;  %v219_v24 = vld [vmem:[%s582_s7 + $0x40] sm:$0xff] }
  0x1d   :  { %177 = vmatpush.msra.mxu2 %v162_v54  ;;  %233 = vmatpush.msra.mxu3 %v224_v19 }
  0x1e   :  { %68 = vmatpush.msra.mxu0 %v35_v14  ;;  %121 = vmatpush.msra.mxu1 %v100_v25  ;;  %v218_v25 = vld [vmem:[%s582_s7 + $0x38] sm:$0xff] }
  0x1f   :  { %178 = vmatpush.msra.mxu2 %v161_v55  ;;  %234 = vmatpush.msra.mxu3 %v223_v20 }
  0x20   :  { %69 = vmatpush.msra.mxu0 %v34_v15  ;;  %122 = vmatpush.msra.mxu1 %v99_v26  ;;  %v217_v26 = vld [vmem:[%s582_s7 + $0x30] sm:$0xff] }
  0x21   :  { %70 = vmatmul.f32.vlgmr.msra.gmra.mxu0 %v33_v16  ;;  %179 = vmatpush.msra.mxu2 %v160_v56 }
  0x22   :  { %123 = vmatpush.msra.mxu1 %v98_v27  ;;  %235 = vmatpush.msra.mxu3 %v222_v21  ;;  %v216_v27 = vld [vmem:[%s582_s7 + $0x28] sm:$0xff] }
  0x23   :  { %180 = vmatpush.msra.mxu2 %v159_v57 }
  0x24   :  { %124 = vmatpush.msra.mxu1 %v97_v28  ;;  %236 = vmatpush.msra.mxu3 %v221_v22  ;;  %v215_v28 = vld [vmem:[%s582_s7 + $0x20] sm:$0xff] }
  0x25   :  { %181 = vmatpush.msra.mxu2 %v158_v58 }
  0x26   :  { %125 = vmatpush.msra.mxu1 %v96_v29  ;;  %237 = vmatpush.msra.mxu3 %v220_v23  ;;  %v214_v29 = vld [vmem:[%s582_s7 + $0x18] sm:$0xff] }
  0x27   :  { %182 = vmatpush.msra.mxu2 %v157_v59 }
  0x28   :  { %126 = vmatpush.msra.mxu1 %v95_v30  ;;  %238 = vmatpush.msra.mxu3 %v219_v24  ;;  %v213_v30 = vld [vmem:[%s582_s7 + $0x10] sm:$0xff] }
  0x29   :  { %183 = vmatpush.msra.mxu2 %v156_v60 }
  0x2a   :  { %127 = vmatpush.msra.mxu1 %v94_v31  ;;  %239 = vmatpush.msra.mxu3 %v218_v25  ;;  %v212_v31 = vld [vmem:[%s582_s7 + $0x8] sm:$0xff] }
  0x2b   :  { %184 = vmatpush.msra.mxu2 %v155_v61 }
  0x2c   :  { %128 = vmatpush.msra.mxu1 %v93_v32  ;;  %240 = vmatpush.msra.mxu3 %v217_v26  ;;  %v211_v32 = vld [vmem:[%s582_s7] sm:$0xff] }
  0x2d   :  { %185 = vmatpush.msra.mxu2 %v154_v62 }
  0x2e   :  { %241 = vmatpush.msra.mxu3 %v216_v27 }
  0x2f   :  { %186 = vmatpush.msra.mxu2 %v153_v63 }
  0x30   :  { %242 = vmatpush.msra.mxu3 %v215_v28 }
  0x31   :  { %187 = vmatpush.msra.mxu2 %v152_v0 }
  0x32   :  { %243 = vmatpush.msra.mxu3 %v214_v29 }
  0x34   :  { %244 = vmatpush.msra.mxu3 %v213_v30 }
  0x36   :  { %245 = vmatpush.msra.mxu3 %v212_v31 }
  0x38   :  { %246 = vmatpush.msra.mxu3 %v211_v32 }
  0x9e   :  { %v71_v34 = vpop.f32.mrf.mxu0 }
  0x9f   :  { %v72_v35 = vadd.f32 %v272_v33, %v71_v34  ;;  %v274_v33 = vld [vmem:[%s581_s6] ss:$0 sm:$0xff] }
  0xa1   :  { %v268_v36 = vmul.f32 -1.442695, %v72_v35 }
  0xa3   :  { %276 = vpow2.f32 %v268_v36 }
  0xa9   :  { %v277_v37 = vpop.eup %276 }
  0xaa   :  { %v77_v38 = vadd.f32 1.0, %v277_v37 }
  0xac   :  { %278 = vrcp.f32 %v77_v38  ;;  %v89_v42 = vand.u32 2147483648, %v77_v38  ;;  %v87_v44 = vand.u32 2147483647, %v77_v38  ;;  %vm83_vm1 = vweird.f32 %v77_v38 }
  0xae   :  { %v90_v46 = vor.u32 1.1754944e-38, %v89_v42  ;;  %vm88_vm3 = vcmp.eq.f32.partialorder %v87_v44, 8.507059e+37 }
  0xb2   :  { %v279_v39 = vpop.eup %278 }
  0xb3   :  { %v79_v40 = vmul.f32 %v279_v39, %v77_v38  ;;  %vm84_vm0 = vweird.f32 %v279_v39 }
  0xb4   :  { %vm85_vm2 = vmor %vm83_vm1, %vm84_vm0 }
  0xb5   :  { %v80_v41 = vsub.f32 1.0, %v79_v40 }
  0xb7   :  { %v81_v43 = vmul.f32 %v279_v39, %v80_v41 }
  0xb9   :  { %v82_v45 = vadd.f32 %v279_v39, %v81_v43 }
  0xbb   :  { %v86_v47 = vsel %vm85_vm2, %v279_v39, %v82_v45 }
  0xbc   :  { %v91_v48 = vsel %vm88_vm3, %v90_v46, %v86_v47 }
  0xbd   :  { %129 = vmatmul.f32.vlgmr.msra.gmra.mxu1 %v91_v48 }
 0x13a   :  { %v130_v2 = vpop.f32.mrf.mxu1 }
 0x13b   :  { %v131_v3 = vadd.f32 %v273_v1, %v130_v2 }
 0x13d   :  { %v269_v4 = vmul.f32 -1.442695, %v131_v3 }
 0x13f   :  { %280 = vpow2.f32 %v269_v4 }
 0x145   :  { %v281_v5 = vpop.eup %280 }
 0x146   :  { %v136_v6 = vadd.f32 1.0, %v281_v5 }
 0x148   :  { %282 = vrcp.f32 %v136_v6  ;;  %v148_v10 = vand.u32 2147483648, %v136_v6  ;;  %v146_v12 = vand.u32 2147483647, %v136_v6  ;;  %vm142_vm5 = vweird.f32 %v136_v6 }
 0x14a   :  { %v149_v14 = vor.u32 1.1754944e-38, %v148_v10  ;;  %vm147_vm7 = vcmp.eq.f32.partialorder %v146_v12, 8.507059e+37 }
 0x14e   :  { %v283_v7 = vpop.eup %282 }
 0x14f   :  { %v138_v8 = vmul.f32 %v283_v7, %v136_v6  ;;  %vm143_vm4 = vweird.f32 %v283_v7 }
 0x150   :  { %vm144_vm6 = vmor %vm142_vm5, %vm143_vm4 }
 0x151   :  { %v139_v9 = vsub.f32 1.0, %v138_v8 }
 0x153   :  { %v140_v11 = vmul.f32 %v283_v7, %v139_v9 }
 0x155   :  { %v141_v13 = vadd.f32 %v283_v7, %v140_v11 }
 0x157   :  { %v145_v15 = vsel %vm144_vm6, %v283_v7, %v141_v13 }
 0x158   :  { %v150_v16 = vsel %vm147_vm7, %v149_v14, %v145_v15 }
 0x159   :  { %188 = vmatmul.f32.vlgmr.msra.gmra.mxu2 %v150_v16 }
 0x1dc   :  { %v189_v34 = vpop.f32.mrf.mxu2 }
 0x1dd   :  { %v190_v35 = vadd.f32 %v274_v33, %v189_v34 }
 0x1df   :  { %v270_v36 = vmul.f32 -1.442695, %v190_v35 }
 0x1e1   :  { %284 = vpow2.f32 %v270_v36 }
 0x1e7   :  { %v285_v37 = vpop.eup %284 }
 0x1e8   :  { %v195_v38 = vadd.f32 1.0, %v285_v37 }
 0x1ea   :  { %286 = vrcp.f32 %v195_v38  ;;  %v207_v42 = vand.u32 2147483648, %v195_v38  ;;  %v205_v44 = vand.u32 2147483647, %v195_v38  ;;  %vm201_vm9 = vweird.f32 %v195_v38 }
 0x1ec   :  { %v208_v46 = vor.u32 1.1754944e-38, %v207_v42  ;;  %vm206_vm11 = vcmp.eq.f32.partialorder %v205_v44, 8.507059e+37 }
 0x1f0   :  { %v287_v39 = vpop.eup %286 }
 0x1f1   :  { %v197_v40 = vmul.f32 %v287_v39, %v195_v38  ;;  %vm202_vm8 = vweird.f32 %v287_v39 }
 0x1f2   :  { %vm203_vm10 = vmor %vm201_vm9, %vm202_vm8 }
 0x1f3   :  { %v198_v41 = vsub.f32 1.0, %v197_v40 }
 0x1f5   :  { %v199_v43 = vmul.f32 %v287_v39, %v198_v41 }
 0x1f7   :  { %v200_v45 = vadd.f32 %v287_v39, %v199_v43 }
 0x1f9   :  { %v204_v47 = vsel %vm203_vm10, %v287_v39, %v200_v45 }
 0x1fa   :  { %v209_v48 = vsel %vm206_vm11, %v208_v46, %v204_v47 }
 0x1fb   :  { %247 = vmatmul.f32.vlgmr.msra.gmra.mxu3 %v209_v48 }
 0x27e   :  { %v248_v50 = vpop.f32.mrf.mxu3 }
 0x27f   :  { %v249_v51 = vadd.f32 %v275_v49, %v248_v50 }
 0x281   :  { %251 = vst [vmem:[#allocation2] sm:$0xff] %v249_v51 }
 0x282   :  { %262 = dma.vmem_to_hbm [thread:$0]  %s258_s23, 128, %s260_s26, [#allocation3]  }
 0x283   :  { %312 = dma.done.wait [#allocation3], 128  }
 0x284   :  { %313 = vsyncadd [#allocation3], 4294967168 }
 0x285   :  { %267 = vsyncpa [#allocation3], 1 }

</bundles_post_ra>
